<compile_context>
chip_gen: v7x
topology: tpu7x:2x2x1
jax: 0.10.0
libtpu: 0.0.40
codegen_flags: <defaults>
</compile_context>

<pallas_src>
import jax
import jax.numpy as jnp
from jax.experimental import pallas as pl
from jax.experimental.pallas import tpu as pltpu


_ROW_UNIT = 8                         # sublane granularity (f32)
_LANE_UNIT = 128                      # lane granularity
_TARGET_TILE_BYTES = 2 * 1024 * 1024  # per-buffer tile budget (safe on all gens)


def _normalize_kernel(mean_ref, inv_sd_ref, x_ref, o_ref):
    # mean_ref / inv_sd_ref: (tR, 1) f32 per-row stats, broadcast across lanes.
    # x_ref / o_ref: (tR, tC) lane-dense tile of the flattened (B*C, H*W) image.
    x = x_ref[...].astype(jnp.float32)
    o_ref[...] = ((x - mean_ref[...]) * inv_sd_ref[...]).astype(o_ref.dtype)


def _pick_tile(dim: int, unit: int, cap: int) -> int:
    """Largest multiple of `unit` that divides `dim` and is <= cap, else full dim."""
    if dim <= cap:
        return dim
    if dim % unit != 0:
        return dim  # can't tile on hardware granularity cleanly; take the whole dim
    t = max((cap // unit) * unit, unit)
    while dim % t != 0:
        t -= unit
    return t


def normalize_layer(x: jax.Array, means: jax.Array, sds: jax.Array) -> jax.Array:
    """(x - means[c]) / sds[c], broadcast over batch and spatial dims (NCHW)."""
    B, C, H, W = x.shape
    R, L = B * C, H * W
    x2d = x.reshape(R, L)

    # Per-row (= per (batch, channel)) statistics; exact f32 reciprocal computed
    # once per channel here (C scalars) -- NOT a pre-scaling pass over x.
    means_rows = jnp.tile(means.astype(jnp.float32), B).reshape(R, 1)
    inv_sd_rows = jnp.tile(1.0 / sds.astype(jnp.float32), B).reshape(R, 1)

    itemsize = jnp.dtype(x.dtype).itemsize
    elems_target = max(_LANE_UNIT, _TARGET_TILE_BYTES // itemsize)
    tC = _pick_tile(L, _LANE_UNIT, elems_target)
    tR = _pick_tile(R, _ROW_UNIT, max(_ROW_UNIT, elems_target // tC))

    grid = (pl.cdiv(R, tR), pl.cdiv(L, tC))  # exact division by construction

    out2d = pl.pallas_call(
        _normalize_kernel,
        out_shape=jax.ShapeDtypeStruct((R, L), x.dtype),
        grid=grid,
        in_specs=[
            pl.BlockSpec((tR, 1), lambda i, j: (i, 0)),    # per-row mean
            pl.BlockSpec((tR, 1), lambda i, j: (i, 0)),    # per-row 1/sd
            pl.BlockSpec((tR, tC), lambda i, j: (i, j)),   # image tile
        ],
        out_specs=pl.BlockSpec((tR, tC), lambda i, j: (i, j)),
        compiler_params=pltpu.CompilerParams(
            dimension_semantics=("parallel", "parallel"),
            vmem_limit_bytes=32 * 1024 * 1024,
        ),
    )(means_rows, inv_sd_rows, x2d)

    return out2d.reshape(B, C, H, W)


if __name__ == "__main__":
    # Small shapes consistent with the module's NCHW conv-input convention.
    B, C, H, W = 2, 4, 16, 16

    key = jax.random.PRNGKey(0)
    x = jax.random.normal(key, (B, C, H, W), dtype=jnp.float32)

    # Deterministic per-channel "dataset" statistics (length-C lists in __init__).
    means = jnp.array([0.485, 0.456, 0.406, 0.5][:C], dtype=jnp.float32)
    sds = jnp.array([0.229, 0.224, 0.225, 0.25][:C], dtype=jnp.float32)

    out = normalize_layer(x, means, sds)
    out = jax.block_until_ready(out)

    # Reference (plain JAX) — same semantics as the PyTorch forward.
    ref = (x - means[None, :, None, None]) / sds[None, :, None, None]
    assert out.shape == (B, C, H, W)
    # Slightly looser tolerance: kernel uses exact-reciprocal multiply vs. divide.
    assert jnp.allclose(out, ref, atol=1e-5, rtol=1e-5)

    print("KERNEL_OK")
</pallas_src>

<mosaic_0001>
module attributes {stable_mosaic.version = 11 : i64} {
  func.func @_normalize_kernel(%arg0: i32, %arg1: i32, %arg2: memref<8x1xf32, #tpu.memory_space<vmem>>, %arg3: memref<8x1xf32, #tpu.memory_space<vmem>>, %arg4: memref<8x256xf32, #tpu.memory_space<vmem>>, %arg5: memref<8x256xf32, #tpu.memory_space<vmem>>) attributes {dimension_semantics = [#tpu.dimension_semantics<parallel>, #tpu.dimension_semantics<parallel>], iteration_bounds = array<i64: 1, 1>, scalar_prefetch = 0 : i64, scratch_operands = 0 : i64, tpu.core_type = #tpu.core_type<tc>, window_params = [{transform_indices = @transform_0, window_bounds = array<i64: 8, 1>}, {transform_indices = @transform_1, window_bounds = array<i64: 8, 1>}, {transform_indices = @transform_2, window_bounds = array<i64: 8, 256>}, {transform_indices = @transform_3, window_bounds = array<i64: 8, 256>}]} {
    %c0 = arith.constant 0 : index
    %c0_0 = arith.constant 0 : index
    %0 = vector.load %arg4[%c0, %c0_0] : memref<8x256xf32, #tpu.memory_space<vmem>>, vector<8x256xf32>
    %c0_1 = arith.constant 0 : index
    %c0_2 = arith.constant 0 : index
    %1 = vector.load %arg2[%c0_1, %c0_2] : memref<8x1xf32, #tpu.memory_space<vmem>>, vector<8x1xf32>
    %2 = vector.broadcast %1 : vector<8x1xf32> to vector<8x256xf32>
    %3 = arith.subf %0, %2 : vector<8x256xf32>
    %c0_3 = arith.constant 0 : index
    %c0_4 = arith.constant 0 : index
    %4 = vector.load %arg3[%c0_3, %c0_4] : memref<8x1xf32, #tpu.memory_space<vmem>>, vector<8x1xf32>
    %5 = vector.broadcast %4 : vector<8x1xf32> to vector<8x256xf32>
    %6 = arith.mulf %3, %5 : vector<8x256xf32>
    %c0_5 = arith.constant 0 : index
    %c0_6 = arith.constant 0 : index
    %7 = vector.load %arg5[%c0_5, %c0_6] : memref<8x256xf32, #tpu.memory_space<vmem>>, vector<8x256xf32>
    tpu.vector_store %arg5[%c0_5, %c0_6], %6 {strides = array<i32>} : memref<8x256xf32, #tpu.memory_space<vmem>>, vector<8x256xf32>,
    return
  }
  func.func @transform_0(%arg0: i32, %arg1: i32) -> (i32, i32) {
    %c0_i32 = arith.constant 0 : i32
    %c0_i32_0 = arith.constant 0 : i32
    return %arg0, %c0_i32 : i32, i32
  }
  func.func @transform_1(%arg0: i32, %arg1: i32) -> (i32, i32) {
    %c0_i32 = arith.constant 0 : i32
    %c0_i32_0 = arith.constant 0 : i32
    return %arg0, %c0_i32 : i32, i32
  }
  func.func @transform_2(%arg0: i32, %arg1: i32) -> (i32, i32) {
    %c0_i32 = arith.constant 0 : i32
    return %arg0, %arg1 : i32, i32
  }
  func.func @transform_3(%arg0: i32, %arg1: i32) -> (i32, i32) {
    %c0_i32 = arith.constant 0 : i32
    return %arg0, %arg1 : i32, i32
  }
}

</mosaic_0001>

<bundles_post_ra>
// kernel: tpu_custom_call.1
= control target key start
LH: loop header
LB: loop body
LE: loop exit
PB: predicated region body
PF: predicated region fallthrough
CT: control target
= control target key end

     0   :  { %s122_s0 = inlined_call_operand.vmem [shape: f32[8,1], index: 0, kind: input, shape index: {}]   ;;  %s123_s1 = inlined_call_operand.vmem [shape: f32[8,1], index: 1, kind: input, shape index: {}]   ;;  %s124_s2 = inlined_call_operand.vmem [shape: f32[8,256], index: 2, kind: input, shape index: {}]   ;;  %s125_s3 = inlined_call_operand.hbm [shape: f32[8,256], index: 3, kind: output, shape index: {}]  }
   0x1   :  { %v17_v0 = vld [vmem:[%s122_s0] sm:$0xff] }
   0x2   :  { %8 = vsyncpa [#allocation3], 0  ;;  %v76_v1 = vmov 0   ;;  %v25_v2 = vld [vmem:[%s123_s1] sm:$0xff]  ;;  %v16_v5 = vld [vmem:[%s124_s2 + $0x8] sm:$0xff]  ;;  %s77_s20 = smov [#allocation2]  }
   0x3   :  { %51 = vset.pattern.permute.xlu0 %v76_v1  ;;  %v15_v4 = vld [vmem:[%s124_s2] sm:$0xff]  ;;  %s41_s0 = sshll.u32 %s77_s20, 4  ;;  %s42_s0 = int_to_ptr.vmem [resolvable:$true] %s41_s0 }
   0x4   :  { %20 = vperm.xlu0 %51, %v17_v0   ;;  %s52_s1 = scalar_lea.vmem %s42_s0, 256  ;;  %p57_p1 = scmp.lt.s32.totalorder %s42_s0, %s42_s0 }
   0x5   :  { %p53_p0 = scmp.ne.s32.totalorder %s42_s0, %s52_s1  ;;  %p58_p2 = scmp.lt.s32.totalorder %s52_s1, %s52_s1 }
   0x7   :  { %p59_p3 = por %p58_p2, %p57_p1 }
   0x8   :  { %28 = vperm.xlu0 %51, %v25_v2  }
   0x9   :  { %p60_p4 = pnand %p59_p3, %p53_p0 }
  0x83   :  { %v21_v3 = vpop.permute.xlu0 %20 }
  0x84   :  { %v23_v6 = vsub.f32 %v15_v4, %v21_v3  ;;  %v24_v7 = vsub.f32 %v16_v5, %v21_v3 }
  0x87   :  { %v29_v8 = vpop.permute.xlu0 %28 }
  0x88   :  { %v31_v9 = vmul.f32 %v29_v8, %v23_v6  ;;  %v32_v10 = vmul.f32 %v29_v8, %v24_v7 }
  0x8a   :  { %33 = vst [vmem:[#allocation2] sm:$0xff] %v31_v9  ;;  %34 = vst [vmem:[#allocation2 + $0x8] sm:$0xff] %v32_v10 }
  0x8b   :  { %63 = shalt.err (!%p60_p4)
}
  0x8c   :  { %s64_s2 = scalar_lea.hbm %s125_s3, 256 }
  0x8d   :  { %p65_p5 = scmp.ne.s32.totalorder %s125_s3, %s64_s2  ;;  %p68_p6 = scmp.lt.u32.totalorder %s64_s2, %s125_s3 }
  0x8f   :  { %p70_p7 = pnand %p68_p6, %p65_p5 }
  0x91   :  { %73 = shalt.err (!%p70_p7)
}
  0x92   :  { %44 = dma.vmem_to_hbm [thread:$0]  %s42_s0, 256, %s125_s3, [#allocation3]  }
  0x93   :  { %74 = dma.done.wait [#allocation3], 256  }
  0x94   :  { %75 = vsyncadd [#allocation3], 4294967040 }
  0x95   :  { %48 = vsyncpa [#allocation3], 1 }

</bundles_post_ra>
